<compile_context>
chip_gen: v7x
topology: tpu7x:2x2x1
jax: 0.10.0
libtpu: 0.0.40
codegen_flags: <defaults>
</compile_context>

<pallas_src>
import functools

import jax
import jax.numpy as jnp
from jax.experimental import pallas as pl
from jax.experimental.pallas import tpu as pltpu


def _round_up(x: int, m: int) -> int:
    return ((x + m - 1) // m) * m


def _cdiv(a: int, b: int) -> int:
    return (a + b - 1) // b


def _vmem_cap_bytes() -> int:
    """~85% of physical VMEM (leave compiler-scratch headroom)."""
    try:
        info = pltpu.get_tpu_info()
        phys = int(getattr(info, "vmem_capacity_bytes", 64 * 1024 * 1024))
    except Exception:
        phys = 64 * 1024 * 1024  # conservative (v7x-sized) fallback
    return int(0.85 * phys)


def _choose_row_tiling(n: int, tile_m: int):
    """Balanced row tiles, multiple of 16 rows, >=2 tiles when N permits."""
    g = max(1, _cdiv(n, tile_m))
    if g == 1 and n >= 32:
        g = 2                          # feed both v7x TensorCores
    tm = _round_up(_cdiv(n, g), 16)
    g = _cdiv(n, tm)
    if g == 1 and n >= 32:
        tm = _round_up(_cdiv(n, 2), 16)
        g = _cdiv(n, tm)
    return tm, g * tm                  # (tile rows, padded N)


def _plan_groups(pdims, weight_budget_bytes):
    """Greedily group consecutive layers whose resident weights fit in VMEM."""
    groups, cur, cur_bytes = [], [], 0
    for i in range(len(pdims) - 1):
        wb = pdims[i] * pdims[i + 1] * 2 + pdims[i + 1] * 4  # bf16 W + f32 b
        if cur and cur_bytes + wb > weight_budget_bytes:
            groups.append(cur)
            cur, cur_bytes = [], 0
        if wb > weight_budget_bytes:
            # TODO(synk): stream a single oversized layer's weight over K tiles
            # (emit_pipeline + f32 accumulator) instead of relying on headroom.
            groups.append([i])
            cur, cur_bytes = [], 0
            continue
        cur.append(i)
        cur_bytes += wb
    if cur:
        groups.append(cur)
    return groups


def _mlp_kernel(*refs, num_layers: int, relu_last: bool, mxu_dtype):
    """refs = (x_ref, w0, b0, ..., w_{L-1}, b_{L-1}, o_ref).

    One grid step pushes one row tile through ALL layers of this group; the
    activation never leaves VMEM/vregs between layers.
    """
    x_ref = refs[0]
    o_ref = refs[-1]
    wb = refs[1:-1]

    h = x_ref[...].astype(mxu_dtype)        # f32 tile -> bf16 on the VPU
    for i in range(num_layers):
        w_ref = wb[2 * i]
        b_ref = wb[2 * i + 1]
        acc = jnp.dot(h, w_ref[...], preferred_element_type=jnp.float32)
        acc = acc + b_ref[...]              # (1, D_out) f32 bias broadcast
        is_last = i == num_layers - 1
        if (not is_last) or relu_last:
            acc = jnp.maximum(acc, 0.0)     # ReLU in f32
        if is_last:
            o_ref[...] = acc.astype(o_ref.dtype)
        else:
            h = acc.astype(mxu_dtype)


def _run_group(xp, g_params, g_pdims, *, relu_last, out_dtype, mxu_dtype,
               tm, n_pad, vmem_cap):
    """One fused pallas_call over a contiguous group of layers."""
    num_layers = len(g_params)
    grid = (n_pad // tm,)

    operands = [xp]
    for li, (w, b) in enumerate(g_params):
        di, do = w.shape
        pdi, pdo = g_pdims[li], g_pdims[li + 1]
        wp = jnp.pad(w.astype(mxu_dtype), ((0, pdi - di), (0, pdo - do)))
        bp = jnp.pad(b.astype(jnp.float32).reshape(1, -1),
                     ((0, 0), (0, pdo - do)))
        operands.extend([wp, bp])

    in_item = jnp.dtype(xp.dtype).itemsize
    out_item = jnp.dtype(out_dtype).itemsize
    w_item = jnp.dtype(mxu_dtype).itemsize

    def build(weight_buffers: int):
        in_specs = [pl.BlockSpec((tm, g_pdims[0]), lambda i: (i, 0))]
        wkw = {"pipeline_mode": pl.Buffered(1)} if weight_buffers == 1 else {}
        for li in range(num_layers):
            pdi, pdo = g_pdims[li], g_pdims[li + 1]
            # Grid-invariant (resident) weights / biases.
            in_specs.append(pl.BlockSpec((pdi, pdo), lambda i: (0, 0), **wkw))
            in_specs.append(pl.BlockSpec((1, pdo), lambda i: (0, 0), **wkw))
        out_spec = pl.BlockSpec((tm, g_pdims[-1]), lambda i: (i, 0))

        # Exact VMEM accounting: double-buffered x/out tiles, (single-)buffered
        # resident weights, f32 activation working set, +25% slack.
        vmem_bytes = 2 * tm * g_pdims[0] * in_item
        vmem_bytes += 2 * tm * g_pdims[-1] * out_item
        for li in range(num_layers):
            vmem_bytes += weight_buffers * (
                g_pdims[li] * g_pdims[li + 1] * w_item + g_pdims[li + 1] * 4)
        vmem_bytes += 3 * tm * max(g_pdims) * 4
        vmem_limit = int(min(vmem_cap,
                             max(32 * 1024 * 1024, int(1.25 * vmem_bytes))))

        flops = 2 * n_pad * sum(g_pdims[i] * g_pdims[i + 1]
                                for i in range(num_layers))
        bytes_accessed = n_pad * g_pdims[0] * in_item
        bytes_accessed += n_pad * g_pdims[-1] * out_item
        bytes_accessed += sum(g_pdims[i] * g_pdims[i + 1] * w_item
                              + g_pdims[i + 1] * 4
                              for i in range(num_layers))
        cost = pl.CostEstimate(flops=flops, transcendentals=0,
                               bytes_accessed=bytes_accessed)

        kernel = functools.partial(_mlp_kernel, num_layers=num_layers,
                                   relu_last=relu_last, mxu_dtype=mxu_dtype)
        return pl.pallas_call(
            kernel,
            out_shape=jax.ShapeDtypeStruct((n_pad, g_pdims[-1]), out_dtype),
            grid_spec=pl.GridSpec(grid=grid, in_specs=in_specs,
                                  out_specs=out_spec),
            compiler_params=pltpu.CompilerParams(
                dimension_semantics=("parallel",),   # row tiles -> 2 TCs on v7x
                vmem_limit_bytes=vmem_limit,
            ),
            cost_estimate=cost,
        )

    try:
        return build(weight_buffers=1)(*operands)
    except Exception:
        # Fallback if pl.Buffered(1) single-buffering is rejected on this build.
        return build(weight_buffers=2)(*operands)


def mlp_forward(x, params, *, tile_m: int = 512, out_dtype=None,
                mxu_dtype=jnp.bfloat16):
    """x: [N, features_dim]; params: list of (W [D_in, D_out], b [1, D_out])."""
    n, d_in = x.shape
    num_layers = len(params)
    assert params[0][0].shape[0] == d_in
    out_dtype = out_dtype if out_dtype is not None else x.dtype

    # Logical and lane-padded (multiple of 128) feature dims per boundary.
    dims = [d_in] + [w.shape[1] for (w, _) in params]
    pdims = [_round_up(d, 128) for d in dims]

    cap = _vmem_cap_bytes()
    groups = _plan_groups(pdims, weight_budget_bytes=cap // 2)

    # Row tiling: balanced, 16-row aligned, >=2 tiles when N permits.
    tm, n_pad = _choose_row_tiling(n, tile_m)

    # Shrink the row tile if tile + resident-weight footprint would overflow.
    w_item = jnp.dtype(mxu_dtype).itemsize
    max_resident = max(sum(pdims[i] * pdims[i + 1] * w_item + pdims[i + 1] * 4
                           for i in grp) for grp in groups)
    max_pd = max(pdims)
    while tm > 16:
        tile_bytes = 2 * 2 * tm * max_pd * 4 + 3 * tm * max_pd * 4
        if max_resident + tile_bytes <= int(0.8 * cap):
            break
        tm = _round_up(max(16, tm // 2), 16)
    n_pad = _cdiv(n, tm) * tm

    # Pad rows / input features only when actually misaligned (no extra HBM
    # pass over x otherwise; dtype cast happens inside the kernel).
    h = x
    if n_pad != n or pdims[0] != d_in:
        h = jnp.pad(h, ((0, n_pad - n), (0, pdims[0] - d_in)))

    for gi, layer_idxs in enumerate(groups):
        is_final_group = gi == len(groups) - 1
        g_params = [params[i] for i in layer_idxs]
        g_pdims = [pdims[layer_idxs[0]]] + [pdims[i + 1] for i in layer_idxs]
        h = _run_group(
            h, g_params, g_pdims,
            relu_last=not is_final_group,            # model-last layer: no ReLU
            out_dtype=out_dtype if is_final_group else mxu_dtype,
            mxu_dtype=mxu_dtype, tm=tm, n_pad=n_pad, vmem_cap=cap)

    # Strip row / lane padding.
    return h[:n, :dims[-1]].astype(out_dtype)


def init_mlp_params(key, num_layers, features_dim, hidden_dim, num_classes,
                    dtype=jnp.float32):
    """Layer shapes mirroring the module:
       layer 0:        features_dim -> hidden_dim
       layers 1..L-2:  hidden_dim   -> hidden_dim
       layer L-1:      hidden_dim   -> num_classes
    """
    dims = [features_dim] + [hidden_dim] * (num_layers - 1) + [num_classes]
    params = []
    for i in range(num_layers):
        d_in, d_out = dims[i], dims[i + 1]
        key, kw, kb = jax.random.split(key, 3)
        bound = 1.0 / jnp.sqrt(jnp.array(d_in, dtype))
        w = jax.random.uniform(kw, (d_in, d_out), dtype, -bound, bound)
        b = jax.random.uniform(kb, (1, d_out), dtype, -bound, bound)
        params.append((w, b))
    return params


if __name__ == "__main__":
    key = jax.random.PRNGKey(0)

    # Small shapes consistent with the module's forward.
    N = 64           # batch of node feature rows
    FEATURES = 128   # features_dim
    HIDDEN = 128     # hidden_dim
    CLASSES = 10     # num_classes
    NUM_LAYERS = 3

    key, kx = jax.random.split(key)
    x = jax.random.normal(kx, (N, FEATURES), jnp.float32)

    params = init_mlp_params(key, NUM_LAYERS, FEATURES, HIDDEN, CLASSES)

    out = mlp_forward(x, params)
    out = jax.block_until_ready(out)

    # Pure-JAX reference with the same bf16-matmul / f32-accumulate recipe.
    h_ref = x
    for i, (w, b) in enumerate(params):
        acc = jnp.dot(h_ref.astype(jnp.bfloat16), w.astype(jnp.bfloat16),
                      preferred_element_type=jnp.float32) + b.astype(jnp.float32)
        if i < NUM_LAYERS - 1:
            acc = jnp.maximum(acc, 0.0)
            h_ref = acc.astype(jnp.bfloat16)
        else:
            h_ref = acc
    h_ref = h_ref.astype(x.dtype)

    assert out.shape == (N, CLASSES)
    assert jnp.allclose(out, h_ref, atol=1e-4, rtol=1e-3), (
        float(jnp.max(jnp.abs(out - h_ref))))

    print("KERNEL_OK")
</pallas_src>

<mosaic_0001>
module attributes {stable_mosaic.version = 11 : i64} {
  func.func @_mlp_kernel(%arg0: i32, %arg1: memref<32x128xf32, #tpu.memory_space<vmem>>, %arg2: memref<128x128xbf16, #tpu.memory_space<vmem>>, %arg3: memref<1x128xf32, #tpu.memory_space<vmem>>, %arg4: memref<128x128xbf16, #tpu.memory_space<vmem>>, %arg5: memref<1x128xf32, #tpu.memory_space<vmem>>, %arg6: memref<128x128xbf16, #tpu.memory_space<vmem>>, %arg7: memref<1x128xf32, #tpu.memory_space<vmem>>, %arg8: memref<32x128xf32, #tpu.memory_space<vmem>>) attributes {dimension_semantics = [#tpu.dimension_semantics<parallel>], iteration_bounds = array<i64: 2>, scalar_prefetch = 0 : i64, scratch_operands = 0 : i64, tpu.core_type = #tpu.core_type<tc>, window_params = [{transform_indices = @transform_0, window_bounds = array<i64: 32, 128>}, {pipeline_mode = #tpu.pipeline_mode<synchronous>, transform_indices = @transform_1, window_bounds = array<i64: 128, 128>}, {pipeline_mode = #tpu.pipeline_mode<synchronous>, transform_indices = @transform_2, window_bounds = array<i64: 1, 128>}, {pipeline_mode = #tpu.pipeline_mode<synchronous>, transform_indices = @transform_3, window_bounds = array<i64: 128, 128>}, {pipeline_mode = #tpu.pipeline_mode<synchronous>, transform_indices = @transform_4, window_bounds = array<i64: 1, 128>}, {pipeline_mode = #tpu.pipeline_mode<synchronous>, transform_indices = @transform_5, window_bounds = array<i64: 128, 128>}, {pipeline_mode = #tpu.pipeline_mode<synchronous>, transform_indices = @transform_6, window_bounds = array<i64: 1, 128>}, {transform_indices = @transform_7, window_bounds = array<i64: 32, 128>}]} {
    %c0 = arith.constant 0 : index
    %c0_0 = arith.constant 0 : index
    %0 = vector.load %arg1[%c0, %c0_0] : memref<32x128xf32, #tpu.memory_space<vmem>>, vector<32x128xf32>
    %1 = arith.truncf %0 : vector<32x128xf32> to vector<32x128xbf16>
    %c0_1 = arith.constant 0 : index
    %c0_2 = arith.constant 0 : index
    %2 = vector.load %arg2[%c0_1, %c0_2] : memref<128x128xbf16, #tpu.memory_space<vmem>>, vector<128x128xbf16>
    %cst = arith.constant dense<0.000000e+00> : vector<32x128xf32>
    %3 = tpu.matmul %1, %2, %cst {dimension_numbers = #tpu.dot_dimension_numbers<[1], [0], [0], [1], [0, 0, 1, 1], [], []>} : vector<32x128xbf16>, vector<128x128xbf16>, vector<32x128xf32> -> vector<32x128xf32>
    %c0_3 = arith.constant 0 : index
    %c0_4 = arith.constant 0 : index
    %4 = vector.load %arg3[%c0_3, %c0_4] : memref<1x128xf32, #tpu.memory_space<vmem>>, vector<1x128xf32>
    %5 = vector.broadcast %4 : vector<1x128xf32> to vector<32x128xf32>
    %6 = arith.addf %3, %5 : vector<32x128xf32>
    %cst_5 = arith.constant 0.000000e+00 : f32
    %7 = vector.broadcast %cst_5 : f32 to vector<32x128xf32>
    %8 = arith.maximumf %6, %7 : vector<32x128xf32>
    %9 = arith.truncf %8 : vector<32x128xf32> to vector<32x128xbf16>
    %c0_6 = arith.constant 0 : index
    %c0_7 = arith.constant 0 : index
    %10 = vector.load %arg4[%c0_6, %c0_7] : memref<128x128xbf16, #tpu.memory_space<vmem>>, vector<128x128xbf16>
    %cst_8 = arith.constant dense<0.000000e+00> : vector<32x128xf32>
    %11 = tpu.matmul %9, %10, %cst_8 {dimension_numbers = #tpu.dot_dimension_numbers<[1], [0], [0], [1], [0, 0, 1, 1], [], []>} : vector<32x128xbf16>, vector<128x128xbf16>, vector<32x128xf32> -> vector<32x128xf32>
    %c0_9 = arith.constant 0 : index
    %c0_10 = arith.constant 0 : index
    %12 = vector.load %arg5[%c0_9, %c0_10] : memref<1x128xf32, #tpu.memory_space<vmem>>, vector<1x128xf32>
    %13 = vector.broadcast %12 : vector<1x128xf32> to vector<32x128xf32>
    %14 = arith.addf %11, %13 : vector<32x128xf32>
    %cst_11 = arith.constant 0.000000e+00 : f32
    %15 = vector.broadcast %cst_11 : f32 to vector<32x128xf32>
    %16 = arith.maximumf %14, %15 : vector<32x128xf32>
    %17 = arith.truncf %16 : vector<32x128xf32> to vector<32x128xbf16>
    %c0_12 = arith.constant 0 : index
    %c0_13 = arith.constant 0 : index
    %18 = vector.load %arg6[%c0_12, %c0_13] : memref<128x128xbf16, #tpu.memory_space<vmem>>, vector<128x128xbf16>
    %cst_14 = arith.constant dense<0.000000e+00> : vector<32x128xf32>
    %19 = tpu.matmul %17, %18, %cst_14 {dimension_numbers = #tpu.dot_dimension_numbers<[1], [0], [0], [1], [0, 0, 1, 1], [], []>} : vector<32x128xbf16>, vector<128x128xbf16>, vector<32x128xf32> -> vector<32x128xf32>
    %c0_15 = arith.constant 0 : index
    %c0_16 = arith.constant 0 : index
    %20 = vector.load %arg7[%c0_15, %c0_16] : memref<1x128xf32, #tpu.memory_space<vmem>>, vector<1x128xf32>
    %21 = vector.broadcast %20 : vector<1x128xf32> to vector<32x128xf32>
    %22 = arith.addf %19, %21 : vector<32x128xf32>
    %c0_17 = arith.constant 0 : index
    %c0_18 = arith.constant 0 : index
    %23 = vector.load %arg8[%c0_17, %c0_18] : memref<32x128xf32, #tpu.memory_space<vmem>>, vector<32x128xf32>
    tpu.vector_store %arg8[%c0_17, %c0_18], %22 {strides = array<i32>} : memref<32x128xf32, #tpu.memory_space<vmem>>, vector<32x128xf32>,
    return
  }
  func.func @transform_0(%arg0: i32) -> (i32, i32) {
    %c0_i32 = arith.constant 0 : i32
    %c0_i32_0 = arith.constant 0 : i32
    return %arg0, %c0_i32 : i32, i32
  }
  func.func @transform_1(%arg0: i32) -> (i32, i32) {
    %c0_i32 = arith.constant 0 : i32
    %c0_i32_0 = arith.constant 0 : i32
    %c0_i32_1 = arith.constant 0 : i32
    return %c0_i32, %c0_i32_0 : i32, i32
  }
  func.func @transform_2(%arg0: i32) -> (i32, i32) {
    %c0_i32 = arith.constant 0 : i32
    %c0_i32_0 = arith.constant 0 : i32
    %c0_i32_1 = arith.constant 0 : i32
    return %c0_i32, %c0_i32_0 : i32, i32
  }
  func.func @transform_3(%arg0: i32) -> (i32, i32) {
    %c0_i32 = arith.constant 0 : i32
    %c0_i32_0 = arith.constant 0 : i32
    %c0_i32_1 = arith.constant 0 : i32
    return %c0_i32, %c0_i32_0 : i32, i32
  }
  func.func @transform_4(%arg0: i32) -> (i32, i32) {
    %c0_i32 = arith.constant 0 : i32
    %c0_i32_0 = arith.constant 0 : i32
    %c0_i32_1 = arith.constant 0 : i32
    return %c0_i32, %c0_i32_0 : i32, i32
  }
  func.func @transform_5(%arg0: i32) -> (i32, i32) {
    %c0_i32 = arith.constant 0 : i32
    %c0_i32_0 = arith.constant 0 : i32
    %c0_i32_1 = arith.constant 0 : i32
    return %c0_i32, %c0_i32_0 : i32, i32
  }
  func.func @transform_6(%arg0: i32) -> (i32, i32) {
    %c0_i32 = arith.constant 0 : i32
    %c0_i32_0 = arith.constant 0 : i32
    %c0_i32_1 = arith.constant 0 : i32
    return %c0_i32, %c0_i32_0 : i32, i32
  }
  func.func @transform_7(%arg0: i32) -> (i32, i32) {
    %c0_i32 = arith.constant 0 : i32
    %c0_i32_0 = arith.constant 0 : i32
    return %arg0, %c0_i32 : i32, i32
  }
}

module attributes {stable_mosaic.version = 11 : i64} {
  func.func @_mlp_kernel(%arg0: i32, %arg1: memref<32x128xf32, #tpu.memory_space<vmem>>, %arg2: memref<128x128xbf16, #tpu.memory_space<vmem>>, %arg3: memref<1x128xf32, #tpu.memory_space<vmem>>, %arg4: memref<128x128xbf16, #tpu.memory_space<vmem>>, %arg5: memref<1x128xf32, #tpu.memory_space<vmem>>, %arg6: memref<128x128xbf16, #tpu.memory_space<vmem>>, %arg7: memref<1x128xf32, #tpu.memory_space<vmem>>, %arg8: memref<32x128xf32, #tpu.memory_space<vmem>>) attributes {dimension_semantics = [#tpu.dimension_semantics<parallel>], iteration_bounds = array<i64: 2>, scalar_prefetch = 0 : i64, scratch_operands = 0 : i64, tpu.core_type = #tpu.core_type<tc>, window_params = [{transform_indices = @transform_0, window_bounds = array<i64: 32, 128>}, {pipeline_mode = #tpu.pipeline_mode<synchronous>, transform_indices = @transform_1, window_bounds = array<i64: 128, 128>}, {pipeline_mode = #tpu.pipeline_mode<synchronous>, transform_indices = @transform_2, window_bounds = array<i64: 1, 128>}, {pipeline_mode = #tpu.pipeline_mode<synchronous>, transform_indices = @transform_3, window_bounds = array<i64: 128, 128>}, {pipeline_mode = #tpu.pipeline_mode<synchronous>, transform_indices = @transform_4, window_bounds = array<i64: 1, 128>}, {pipeline_mode = #tpu.pipeline_mode<synchronous>, transform_indices = @transform_5, window_bounds = array<i64: 128, 128>}, {pipeline_mode = #tpu.pipeline_mode<synchronous>, transform_indices = @transform_6, window_bounds = array<i64: 1, 128>}, {transform_indices = @transform_7, window_bounds = array<i64: 32, 128>}]} {
    %c0 = arith.constant 0 : index
    %c0_0 = arith.constant 0 : index
    %0 = vector.load %arg1[%c0, %c0_0] : memref<32x128xf32, #tpu.memory_space<vmem>>, vector<32x128xf32>
    %1 = arith.truncf %0 : vector<32x128xf32> to vector<32x128xbf16>
    %c0_1 = arith.constant 0 : index
    %c0_2 = arith.constant 0 : index
    %2 = vector.load %arg2[%c0_1, %c0_2] : memref<128x128xbf16, #tpu.memory_space<vmem>>, vector<128x128xbf16>
    %cst = arith.constant dense<0.000000e+00> : vector<32x128xf32>
    %3 = tpu.matmul %1, %2, %cst {dimension_numbers = #tpu.dot_dimension_numbers<[1], [0], [0], [1], [0, 0, 1, 1], [], []>} : vector<32x128xbf16>, vector<128x128xbf16>, vector<32x128xf32> -> vector<32x128xf32>
    %c0_3 = arith.constant 0 : index
    %c0_4 = arith.constant 0 : index
    %4 = vector.load %arg3[%c0_3, %c0_4] : memref<1x128xf32, #tpu.memory_space<vmem>>, vector<1x128xf32>
    %5 = vector.broadcast %4 : vector<1x128xf32> to vector<32x128xf32>
    %6 = arith.addf %3, %5 : vector<32x128xf32>
    %cst_5 = arith.constant 0.000000e+00 : f32
    %7 = vector.broadcast %cst_5 : f32 to vector<32x128xf32>
    %8 = arith.maximumf %6, %7 : vector<32x128xf32>
    %9 = arith.truncf %8 : vector<32x128xf32> to vector<32x128xbf16>
    %c0_6 = arith.constant 0 : index
    %c0_7 = arith.constant 0 : index
    %10 = vector.load %arg4[%c0_6, %c0_7] : memref<128x128xbf16, #tpu.memory_space<vmem>>, vector<128x128xbf16>
    %cst_8 = arith.constant dense<0.000000e+00> : vector<32x128xf32>
    %11 = tpu.matmul %9, %10, %cst_8 {dimension_numbers = #tpu.dot_dimension_numbers<[1], [0], [0], [1], [0, 0, 1, 1], [], []>} : vector<32x128xbf16>, vector<128x128xbf16>, vector<32x128xf32> -> vector<32x128xf32>
    %c0_9 = arith.constant 0 : index
    %c0_10 = arith.constant 0 : index
    %12 = vector.load %arg5[%c0_9, %c0_10] : memref<1x128xf32, #tpu.memory_space<vmem>>, vector<1x128xf32>
    %13 = vector.broadcast %12 : vector<1x128xf32> to vector<32x128xf32>
    %14 = arith.addf %11, %13 : vector<32x128xf32>
    %cst_11 = arith.constant 0.000000e+00 : f32
    %15 = vector.broadcast %cst_11 : f32 to vector<32x128xf32>
    %16 = arith.maximumf %14, %15 : vector<32x128xf32>
    %17 = arith.truncf %16 : vector<32x128xf32> to vector<32x128xbf16>
    %c0_12 = arith.constant 0 : index
    %c0_13 = arith.constant 0 : index
    %18 = vector.load %arg6[%c0_12, %c0_13] : memref<128x128xbf16, #tpu.memory_space<vmem>>, vector<128x128xbf16>
    %cst_14 = arith.constant dense<0.000000e+00> : vector<32x128xf32>
    %19 = tpu.matmul %17, %18, %cst_14 {dimension_numbers = #tpu.dot_dimension_numbers<[1], [0], [0], [1], [0, 0, 1, 1], [], []>} : vector<32x128xbf16>, vector<128x128xbf16>, vector<32x128xf32> -> vector<32x128xf32>
    %c0_15 = arith.constant 0 : index
    %c0_16 = arith.constant 0 : index
    %20 = vector.load %arg7[%c0_15, %c0_16] : memref<1x128xf32, #tpu.memory_space<vmem>>, vector<1x128xf32>
    %21 = vector.broadcast %20 : vector<1x128xf32> to vector<32x128xf32>
    %22 = arith.addf %19, %21 : vector<32x128xf32>
    %c0_17 = arith.constant 0 : index
    %c0_18 = arith.constant 0 : index
    %23 = vector.load %arg8[%c0_17, %c0_18] : memref<32x128xf32, #tpu.memory_space<vmem>>, vector<32x128xf32>
    tpu.vector_store %arg8[%c0_17, %c0_18], %22 {strides = array<i32>} : memref<32x128xf32, #tpu.memory_space<vmem>>, vector<32x128xf32>,
    return
  }
  func.func @transform_0(%arg0: i32) -> (i32, i32) {
    %c0_i32 = arith.constant 0 : i32
    %c0_i32_0 = arith.constant 0 : i32
    return %arg0, %c0_i32 : i32, i32
  }
  func.func @transform_1(%arg0: i32) -> (i32, i32) {
    %c0_i32 = arith.constant 0 : i32
    %c0_i32_0 = arith.constant 0 : i32
    %c0_i32_1 = arith.constant 0 : i32
    return %c0_i32, %c0_i32_0 : i32, i32
  }
  func.func @transform_2(%arg0: i32) -> (i32, i32) {
    %c0_i32 = arith.constant 0 : i32
    %c0_i32_0 = arith.constant 0 : i32
    %c0_i32_1 = arith.constant 0 : i32
    return %c0_i32, %c0_i32_0 : i32, i32
  }
  func.func @transform_3(%arg0: i32) -> (i32, i32) {
    %c0_i32 = arith.constant 0 : i32
    %c0_i32_0 = arith.constant 0 : i32
    %c0_i32_1 = arith.constant 0 : i32
    return %c0_i32, %c0_i32_0 : i32, i32
  }
  func.func @transform_4(%arg0: i32) -> (i32, i32) {
    %c0_i32 = arith.constant 0 : i32
    %c0_i32_0 = arith.constant 0 : i32
    %c0_i32_1 = arith.constant 0 : i32
    return %c0_i32, %c0_i32_0 : i32, i32
  }
  func.func @transform_5(%arg0: i32) -> (i32, i32) {
    %c0_i32 = arith.constant 0 : i32
    %c0_i32_0 = arith.constant 0 : i32
    %c0_i32_1 = arith.constant 0 : i32
    return %c0_i32, %c0_i32_0 : i32, i32
  }
  func.func @transform_6(%arg0: i32) -> (i32, i32) {
    %c0_i32 = arith.constant 0 : i32
    %c0_i32_0 = arith.constant 0 : i32
    %c0_i32_1 = arith.constant 0 : i32
    return %c0_i32, %c0_i32_0 : i32, i32
  }
  func.func @transform_7(%arg0: i32) -> (i32, i32) {
    %c0_i32 = arith.constant 0 : i32
    %c0_i32_0 = arith.constant 0 : i32
    return %arg0, %c0_i32 : i32, i32
  }
}

</mosaic_0001>

<bundles_post_ra>
// kernel: tpu_custom_call.1
= control target key start
LH: loop header
LB: loop body
LE: loop exit
PB: predicated region body
PF: predicated region fallthrough
CT: control target
= control target key end

     0   :  { %12 = vsyncpa [#allocation3], 0  ;;  %s1616_s0 = inlined_call_operand.hbm [shape: f32[64,128], index: 0, kind: input, shape index: {}]   ;;  %s1617_s1 = inlined_call_operand.hbm [shape: bf16[128,128], index: 1, kind: input, shape index: {}]   ;;  %s1618_s2 = inlined_call_operand.vmem [shape: f32[1,128], index: 2, kind: input, shape index: {}]   ;;  %s1619_s3 = inlined_call_operand.hbm [shape: bf16[128,128], index: 3, kind: input, shape index: {}]   ;;  %s1620_s4 = inlined_call_operand.vmem [shape: f32[1,128], index: 4, kind: input, shape index: {}]   ;;  %s1621_s5 = inlined_call_operand.hbm [shape: bf16[128,128], index: 5, kind: input, shape index: {}]   ;;  %s1622_s6 = inlined_call_operand.vmem [shape: f32[1,128], index: 6, kind: input, shape index: {}]   ;;  %s1623_s7 = inlined_call_operand.hbm [shape: f32[64,128], index: 7, kind: output, shape index: {}]  }
   0x1   :  { %14 = vsyncpa [#allocation3 + $0x1], 0 }
   0x2   :  { %15 = vsyncpa [#allocation6], 0 }
   0x3   :  { %16 = vsyncpa [#allocation9], 0 }
   0x4   :  { %17 = vsyncpa [#allocation4], 0 }
   0x5   :  { %19 = vsyncpa [#allocation4 + $0x1], 0  ;;  %s1329_s24 = smov 0   ;;  %s1331_s25 = smov 0  }
   0x6   :  { %s1333_s26 = smov 0   ;;  %s1335_s27 = smov 0  }
   0x7 LB: > { %s1350_s28 = sadd.s32 4294967295, %s1276_s27   ;;  %s842_s29 = sadd.s32 4294967294, %s1276_s27   ;;  %s1276_s27 = sphi %s1335_s27, %s1649_s27   ;;  %s1272_s26 = sphi %s1333_s26, %s1648_s26   ;;  %s1268_s25 = sphi %s1331_s25, %s1647_s25   ;;  %s1264_s24 = sphi %s1329_s24, %s1646_s24  }
   0x8   : > { %p45_p0 = scmp.ne.s32.totalorder %s1268_s25, %s1264_s24  ;;  %p1624_p1 = scmp.eq.s32.totalorder %s1350_s28, 0 }
   0x9   : > { %p201_p3 = scmp.eq.s32.totalorder %s842_s29, 1  ;;  %p843_p5 = scmp.ge.s32.totalorder %s1276_s27, 1 }
   0xa   : > { %p1359_p4 = por %p1624_p1, %p45_p0  ;;  %p208_p7 = scmp.lt.s32.totalorder %s1276_s27, 3 }
   0xb   : > { %p1364_p6 = por %p201_p3, %p45_p0  ;;  %s1278_s10 = smov [#allocation5]  }
   0xc   : > { %s1628_s30 = scalar_select %p1359_p4, 1, 0 }
   0xd   : > { %s1629_s8 = scalar_select %p1364_p6, 1, 0 }
   0xe   : > { %p1369_p8 = pnand %p843_p5, %p208_p7  ;;  %s220_s11 = sshll.u32 %s1278_s10, 4  ;;  %s1373_s11 = int_to_ptr.vmem [resolvable:$true] %s220_s11 }
   0xf   : > { %1630 = sst [smem:[#allocation15_spill]] %s1629_s8  ;;  %s1279_s13 = smov [#allocation7]  }
  0x10   : > { %s1631_s9 = scalar_select %p1369_p8, 1, 0 }
  0x11   : > { %p997_p9 = pneg %p1369_p8  ;;  %s236_s14 = sshll.u32 %s1279_s13, 4  ;;  %s1384_s14 = int_to_ptr.vmem [resolvable:$true] %s236_s14 }
  0x12   : > { %s1280_s15 = smov [#allocation8]   ;;  %s1088_s19 = scalar_lea.hbm %s1617_s1, 1024 }
  0x13   : > { %p1380_p11 = pnand %p997_p9, %p1624_p1  ;;  %s1386_s16 = sshll.u32 %s1280_s15, 4  ;;  %s253_s16 = int_to_ptr.vmem [resolvable:$true] %s1386_s16 }
  0x14   : > { %p1089_p12 = scmp.ne.s32.totalorder %s1617_s1, %s1088_s19  ;;  %p1095_p5 = scmp.lt.u32.totalorder %s1088_s19, %s1617_s1 }
  0x15   : > { %p1396_p13 = pneg %p1380_p11 }
  0x17   : > { %p1091_p0 = pnand %p1396_p13, %p1089_p12 }
  0x19   : > { %p1092_p3 = pneg %p1091_p0 }
  0x1b   : > { %p1097_p7 = pnand %p1095_p5, %p1092_p3 }
  0x1d   : > { %1100 = shalt.err (!%p1097_p7)
}
  0x1e   : > { %s1101_s10 = scalar_lea.vmem %s1373_s11, 1024  ;;  %p1109_p2 = scmp.lt.s32.totalorder %s1373_s11, %s1373_s11 }
  0x1f   : > { %p1102_p9 = scmp.ne.s32.totalorder %s1373_s11, %s1101_s10  ;;  %p1110_p6 = scmp.lt.s32.totalorder %s1101_s10, %s1101_s10 }
  0x21   : > { %p1104_p10 = pnand %p1102_p9, %p1396_p13  ;;  %p1111_p12 = por %p1110_p6, %p1109_p2 }
  0x23   : > { %p1105_p1 = pneg %p1104_p10 }
  0x25   : > { %p1112_p0 = pnand %p1111_p12, %p1105_p1 }
  0x27   : > { %1115 = shalt.err (!%p1112_p0)
}
  0x28   : > { %s1281_s13 = smov 64   ;;  %s1282_s15 = smov 4  }
  0x29   : > { %1000 = dma.hbm_to_vmem [thread:$0]  (!%p1380_p11), %s1617_s1, 1024, %s1373_s11, [#allocation6], %s1281_s13, %s1281_s13, %s1282_s15  }
  0x2a   : > { %s1116_s21 = scalar_lea.hbm %s1619_s3, 1024 }
  0x2b   : > { %p1117_p1 = scmp.ne.s32.totalorder %s1619_s3, %s1116_s21  ;;  %p1123_p10 = scmp.lt.u32.totalorder %s1116_s21, %s1619_s3 }
  0x2d   : > { %p1119_p2 = pnand %p1117_p1, %p1396_p13 }
  0x2f   : > { %p1120_p6 = pneg %p1119_p2 }
  0x31   : > { %p1125_p3 = pnand %p1123_p10, %p1120_p6 }
  0x33   : > { %1128 = shalt.err (!%p1125_p3)
}
  0x34   : > { %s1129_s11 = scalar_lea.vmem %s1384_s14, 1024  ;;  %p1137_p12 = scmp.lt.s32.totalorder %s1384_s14, %s1384_s14 }
  0x35   : > { %p1130_p5 = scmp.ne.s32.totalorder %s1384_s14, %s1129_s11  ;;  %p1138_p0 = scmp.lt.s32.totalorder %s1129_s11, %s1129_s11 }
  0x37   : > { %p1132_p7 = pnand %p1130_p5, %p1396_p13  ;;  %p1139_p1 = por %p1138_p0, %p1137_p12 }
  0x39   : > { %p1133_p9 = pneg %p1132_p7 }
  0x3b   : > { %p1140_p2 = pnand %p1139_p1, %p1133_p9 }
  0x3d   : > { %1143 = shalt.err (!%p1140_p2)
}
  0x3e   : > { %1003 = dma.hbm_to_vmem [thread:$0]  (!%p1380_p11), %s1619_s3, 1024, %s1384_s14, [#allocation6], %s1281_s13, %s1281_s13, %s1282_s15  }
  0x3f   : > { %s1144_s20 = scalar_lea.hbm %s1621_s5, 1024 }
  0x40   : > { %p1145_p6 = scmp.ne.s32.totalorder %s1621_s5, %s1144_s20  ;;  %p1151_p5 = scmp.lt.u32.totalorder %s1144_s20, %s1621_s5 }
  0x42   : > { %p1147_p10 = pnand %p1145_p6, %p1396_p13 }
  0x44   : > { %p1148_p3 = pneg %p1147_p10 }
  0x46   : > { %p1153_p7 = pnand %p1151_p5, %p1148_p3 }
  0x48   : > { %1156 = shalt.err (!%p1153_p7)
}
  0x49   : > { %s1157_s11 = scalar_lea.vmem %s253_s16, 1024  ;;  %p1165_p1 = scmp.lt.s32.totalorder %s253_s16, %s253_s16 }
  0x4a   : > { %p1158_p9 = scmp.ne.s32.totalorder %s253_s16, %s1157_s11  ;;  %p1166_p2 = scmp.lt.s32.totalorder %s1157_s11, %s1157_s11 }
  0x4c   : > { %p1160_p12 = pnand %p1158_p9, %p1396_p13  ;;  %p1167_p4 = por %p1166_p2, %p1165_p1 }
  0x4e   : > { %p1161_p0 = pneg %p1160_p12 }
  0x50   : > { %p1168_p8 = pnand %p1167_p4, %p1161_p0 }
  0x52   : > { %1171 = shalt.err (!%p1168_p8)
}
  0x53   : > { %1006 = dma.hbm_to_vmem [thread:$0]  (!%p1380_p11), %s1621_s5, 1024, %s253_s16, [#allocation9], %s1281_s13, %s1281_s13, %s1282_s15  }
  0x54   : > { %s1469_s22 = sadd.s32 1, %s1276_s27   ;;  %s32_s17 = sadd.s32 1, %s1272_s26 }
  0x55   : > { %s29_s12 = ssub.s32 %s1276_s27, %s1469_s22  ;;  %p39_p8 = scmp.ne.s32.totalorder %s1272_s26, %s1268_s25 }
  0x56   : > { %p30_p4 = scmp.eq.s32.totalorder %s29_s12, 0  ;;  %p40_p13 = scmp.eq.s32.totalorder %s1276_s27, 0 }
  0x57   : > { %p1018_p6 = scmp.lt.s32.totalorder %s1276_s27, 2  ;;  %p1634_p3 = scmp.eq.s32.totalorder %s1350_s28, 1 }
  0x58   : > { %s1479_s18 = scalar_select %p30_p4, %s1272_s26, %s32_s17  }
  0x59   : > { %p41_p10 = por %p40_p13, %p39_p8  ;;  %p1483_p5 = por %p1634_p3, %p39_p8 }
  0x5a   : > { %s269_s20 = sand.u32 1, %s1272_s26   ;;  %s889_s21 = sshll.u32 %s1276_s27, 9 }
  0x5b   : > { %s848_s16 = sshll.u32 %s269_s20, 5  ;;  %s1492_s23 = scalar_lea.hbm %s1616_s0, %s889_s21 }
  0x5c   : > { %s273_s29 = scalar_lea.vmem [#allocation2], %s848_s16  ;;  %p1494_p11 = pnand %p1018_p6, %p41_p10 }
  0x5d   : > { %s280_s10 = sshll.u32 %s273_s29, 4  ;;  %s1500_s14 = scalar_lea.sflag [#allocation3], %s269_s20  ;;  %s1498_s10 = int_to_ptr.vmem [resolvable:$true] %s280_s10 }
  0x5e   : > { %s1172_s8 = scalar_lea.hbm %s1492_s23, 512  ;;  %p1174_p9 = pneg %p1494_p11 }
  0x5f   : > { %p1173_p7 = scmp.ne.s32.totalorder %s1492_s23, %s1172_s8  ;;  %s1177_s21 = scalar_lea.hbm %s1616_s0, 1024 }
  0x60   : > { %p1178_p1 = scmp.lt.u32.totalorder %s1492_s23, %s1616_s0  ;;  %p1179_p2 = scmp.lt.u32.totalorder %s1177_s21, %s1172_s8 }
  0x61   : > { %p1175_p12 = pnand %p1174_p9, %p1173_p7  ;;  %p1181_p8 = scmp.lt.u32.totalorder %s1172_s8, %s1492_s23 }
  0x62   : > { %p1180_p4 = por %p1179_p2, %p1178_p1 }
  0x63   : > { %p1176_p0 = pneg %p1175_p12 }
  0x64   : > { %p1182_p13 = por %p1181_p8, %p1180_p4 }
  0x66   : > { %p1183_p6 = pnand %p1182_p13, %p1176_p0 }
  0x68   : > { %1186 = shalt.err (!%p1183_p6)
}
  0x69   : > { %s1187_s20 = scalar_lea.vmem %s1498_s10, 512  ;;  %s1283_s15 = smov [#allocation2]  }
  0x6a   : > { %p1188_p10 = scmp.ne.s32.totalorder %s1498_s10, %s1187_s20  ;;  %s1192_s29 = sshll.u32 %s1283_s15, 4  ;;  %s1193_s29 = int_to_ptr.vmem [resolvable:$false] %s1192_s29 }
  0x6b   : > { %s1194_s12 = scalar_lea.vmem %s1193_s29, 1024  ;;  %p1195_p12 = scmp.lt.s32.totalorder %s1498_s10, %s1193_s29 }
  0x6c   : > { %p1190_p3 = pnand %p1188_p10, %p1174_p9  ;;  %p1196_p1 = scmp.lt.s32.totalorder %s1194_s12, %s1187_s20 }
  0x6e   : > { %p1191_p7 = pneg %p1190_p3  ;;  %p1197_p2 = por %p1196_p1, %p1195_p12 }
  0x70   : > { %p1198_p4 = pnand %p1197_p2, %p1191_p7 }
  0x72   : > { %1201 = shalt.err (!%p1198_p4)
}
  0x73   : > { %s1284_s8 = smov 128   ;;  %s1285_s17 = smov 8  }
  0x74   : > { %1010 = dma.hbm_to_vmem [thread:$0]  (!%p1494_p11), %s1492_s23, 512, %s1498_s10, %s1500_s14, %s1284_s8, %s1284_s8, %s1285_s17  }
  0x75   : > { %p1637_p9 = scmp.ne.s32.totalorder %s1631_s9, 0 }
  0x76   : > { %s1531_s21 = sand.u32 (!%p1637_p9), 1, %s1268_s25   ;;  %p1638_p0 = scmp.ne.s32.totalorder (!%p1637_p9), %s1628_s30, 0 }
  0x77   : > { %292 = sbr.rel (%p1637_p9) target bundleno = 843 (0x34b), region = 48  ;;  %s852_s16 = sshll.u32 (!%p1637_p9), %s1531_s21, 5 }
  0x78   : > { %s295_s13 = scalar_lea.sflag (!%p1637_p9), [#allocation3], %s1531_s21  ;;  %s1537_s20 = scalar_lea.vmem (!%p1637_p9), [#allocation2], %s852_s16 }
  0x7e   : > { %1247 = dma.done.wait (%p1638_p0), %s295_s13, 512  }
  0x7f   : > { %1249 = vsyncadd (%p1638_p0), %s295_s13, 4294966784  ;;  %p1639_p11 = scmp.eq.s32.totalorder %s1350_s28, 0 }
  0x81   : > { %1251 = dma.done.wait (%p1639_p11), [#allocation6], 2048   ;;  %p1640_p8 = pmov %p1639_p11 }
  0x83   : > { %1253 = vsyncadd (%p1640_p8), [#allocation6], 4294965248  ;;  %p1641_p13 = pmov %p1640_p8 }
  0x84   : > { %p1642_p6 = pmov %p1640_p8 }
  0x85   : > { %1255 = dma.done.wait (%p1641_p13), [#allocation9], 1024  }
  0x86   : > { %1257 = vsyncadd (%p1642_p6), [#allocation9], 4294966272  ;;  %v1064_v0 = vld [vmem:[#allocation5] sm:$0xff]   ;;  %v1065_v1 = vld [vmem:[#allocation5 + $0x8] sm:$0xff]   ;;  %s340_s15 = scalar_lea.vmem [#allocation10], %s852_s16  ;;  %s890_s12 = sshll.u32 %s1350_s28, 9 }
  0x87   : > { %921 = vmatprep.subr.bf16.mxu0 %v1064_v0  ;;  %v1066_v2 = vld [vmem:[#allocation5 + $0x10] sm:$0xff]   ;;  %v1067_v3 = vld [vmem:[#allocation5 + $0x18] sm:$0xff]   ;;  %v344_v4 = vld [vmem:[%s1537_s20] sm:$0xff]  ;;  %s740_s29 = sshll.u32 %s340_s15, 4  ;;  %s1572_s16 = scalar_lea.hbm %s1623_s7, %s890_s12  ;;  %s1567_s29 = int_to_ptr.vmem [resolvable:$true] %s740_s29 }
  0x88   : > { %922 = vmatpush3.bf16.msra.mxu0 %v1064_v0  ;;  %v345_v5 = vld [vmem:[%s1537_s20 + $0x8] sm:$0xff]  ;;  %v1072_v7 = vld [vmem:[#allocation7] sm:$0xff]   ;;  %v1074_v10 = vld [vmem:[#allocation7 + $0x10] sm:$0xff]   ;;  %s727_s28 = scalar_lea.sflag [#allocation4], %s1531_s21  ;;  %s1202_s13 = scalar_lea.vmem %s1567_s29, 512 }
  0x89   : > { %923 = vmatprep.subr.bf16.mxu0 %v1065_v1  ;;  %v348_v6 = vpack.c.bf16 %v345_v5, %v344_v4  ;;  %v1073_v8 = vld [vmem:[#allocation7 + $0x8] sm:$0xff]   ;;  %v1068_v9 = vld [vmem:[#allocation5 + $0x20] sm:$0xff]   ;;  %941 = vmatprep.subr.bf16.mxu1 %v1072_v7  ;;  %v1075_v12 = vld [vmem:[#allocation7 + $0x18] sm:$0xff]   ;;  %p1203_p10 = scmp.ne.s32.totalorder %s1567_s29, %s1202_s13 }
  0x8a   : > { %942 = vmatpush3.bf16.msra.mxu1 %v1072_v7  ;;  %v1069_v11 = vld [vmem:[#allocation5 + $0x28] sm:$0xff]   ;;  %v1070_v13 = vld [vmem:[#allocation5 + $0x30] sm:$0xff]   ;;  %v1076_v14 = vld [vmem:[#allocation7 + $0x20] sm:$0xff]  }
  0x8b   : > { %937 = vmatprep.mubr.bf16.mxu0 %v348_v6  ;;  %943 = vmatprep.subr.bf16.mxu1 %v1073_v8  ;;  %v1071_v15 = vld [vmem:[#allocation5 + $0x38] sm:$0xff]   ;;  %v1077_v16 = vld [vmem:[#allocation7 + $0x28] sm:$0xff]   ;;  %v346_v17 = vld [vmem:[%s1537_s20 + $0x10] sm:$0xff]  ;;  %p1204_p3 = pnand %p1203_p10, %p1483_p5 }
  0x8c   : > { %924 = vmatpush3.bf16.msra.mxu0 %v1065_v1  ;;  %v347_v18 = vld [vmem:[%s1537_s20 + $0x18] sm:$0xff]  ;;  %v1078_v20 = vld [vmem:[#allocation7 + $0x30] sm:$0xff]   ;;  %v1080_v22 = vld [vmem:[#allocation8] sm:$0xff]   ;;  %s1286_s20 = smov [#allocation10]  }
  0x8d   : > { %925 = vmatprep.subr.bf16.mxu0 %v1066_v2  ;;  %v349_v19 = vpack.c.bf16 %v347_v18, %v346_v17  ;;  %v1079_v21 = vld [vmem:[#allocation7 + $0x38] sm:$0xff]   ;;  %v1081_v23 = vld [vmem:[#allocation8 + $0x8] sm:$0xff]   ;;  %v1082_v24 = vld [vmem:[#allocation8 + $0x10] sm:$0xff]   ;;  %p1205_p7 = pneg %p1204_p3  ;;  %s1206_s30 = sshll.u32 %s1286_s20, 4  ;;  %s1207_s30 = int_to_ptr.vmem [resolvable:$false] %s1206_s30 }
  0x8e   : > { %944 = vmatpush3.bf16.msra.mxu1 %v1073_v8  ;;  %v1083_v25 = vld [vmem:[#allocation8 + $0x18] sm:$0xff]   ;;  %v1084_v26 = vld [vmem:[#allocation8 + $0x20] sm:$0xff]   ;;  %v1085_v27 = vld [vmem:[#allocation8 + $0x28] sm:$0xff]   ;;  %s1208_s9 = scalar_lea.vmem %s1207_s30, 1024  ;;  %p1209_p12 = scmp.lt.s32.totalorder %s1567_s29, %s1207_s30 }
  0x8f   : > { %945 = vmatprep.subr.bf16.mxu1 %v1074_v10  ;;  %v857_v28 = vld [vmem:[%s1618_s2] ss:$0 sm:$0xff]  ;;  %v1086_v43 = vld [vmem:[#allocation8 + $0x30] sm:$0xff]   ;;  %v1087_v44 = vld [vmem:[#allocation8 + $0x38] sm:$0xff]   ;;  %p1210_p1 = scmp.lt.s32.totalorder %s1208_s9, %s1202_s13 }
  0x90   : > { %926 = vmatpush3.bf16.msra.mxu0 %v1066_v2  ;;  %v866_v45 = vld [vmem:[%s1620_s4] ss:$0 sm:$0xff] }
  0x91   : > { %927 = vmatprep.subr.bf16.mxu0 %v1067_v3  ;;  %v875_v60 = vld [vmem:[%s1622_s6] ss:$0 sm:$0xff]  ;;  %p1211_p2 = por %p1210_p1, %p1209_p12 }
  0x92   : > { %946 = vmatpush3.bf16.msra.mxu1 %v1074_v10 }
  0x93   : > { %947 = vmatprep.subr.bf16.mxu1 %v1075_v12  ;;  %p1212_p4 = pnand %p1211_p2, %p1205_p7 }
  0x94   : > { %928 = vmatpush3.bf16.msra.mxu0 %v1067_v3 }
  0x95   : > { %929 = vmatprep.subr.bf16.mxu0 %v1068_v9 }
  0x96   : > { %948 = vmatpush3.bf16.msra.mxu1 %v1075_v12 }
  0x97   : > { %949 = vmatprep.subr.bf16.mxu1 %v1076_v14 }
  0x98   : > { %930 = vmatpush3.bf16.msra.mxu0 %v1068_v9 }
  0x99   : > { %931 = vmatprep.subr.bf16.mxu0 %v1069_v11 }
  0x9a   : > { %950 = vmatpush3.bf16.msra.mxu1 %v1076_v14 }
  0x9b   : > { %951 = vmatprep.subr.bf16.mxu1 %v1077_v16 }
  0x9c   : > { %932 = vmatpush3.bf16.msra.mxu0 %v1069_v11 }
  0x9d   : > { %933 = vmatprep.subr.bf16.mxu0 %v1070_v13 }
  0x9e   : > { %952 = vmatpush3.bf16.msra.mxu1 %v1077_v16 }
  0x9f   : > { %953 = vmatprep.subr.bf16.mxu1 %v1078_v20 }
  0xa0   : > { %934 = vmatpush3.bf16.msra.mxu0 %v1070_v13 }
  0xa1   : > { %935 = vmatprep.subr.bf16.mxu0 %v1071_v15 }
  0xa2   : > { %954 = vmatpush3.bf16.msra.mxu1 %v1078_v20 }
  0xa3   : > { %955 = vmatprep.subr.bf16.mxu1 %v1079_v21 }
  0xa4   : > { %936 = vmatpush3.bf16.msra.mxu0 %v1071_v15 }
  0xa5   : > { %961 = vmatprep.subr.bf16.mxu0 %v1080_v22 }
  0xa6   : > { %956 = vmatpush3.bf16.msra.mxu1 %v1079_v21 }
  0xa7   : > { %938 = vmatmul.mubr.bf16.vlgmr.msra.gmra.mrb[0].mxu0 %v349_v19 }
  0xa8   : > { %962 = vmatpush3.bf16.msra.mxu0 %v1080_v22 }
  0xa9   : > { %963 = vmatprep.subr.bf16.mxu0 %v1081_v23 }
  0xac   : > { %964 = vmatpush3.bf16.msra.mxu0 %v1081_v23 }
  0xad   : > { %965 = vmatprep.subr.bf16.mxu0 %v1082_v24 }
  0xb0   : > { %966 = vmatpush3.bf16.msra.mxu0 %v1082_v24 }
  0xb1   : > { %967 = vmatprep.subr.bf16.mxu0 %v1083_v25 }
  0xb4   : > { %968 = vmatpush3.bf16.msra.mxu0 %v1083_v25 }
  0xb5   : > { %969 = vmatprep.subr.bf16.mxu0 %v1084_v26 }
  0xb8   : > { %970 = vmatpush3.bf16.msra.mxu0 %v1084_v26 }
  0xb9   : > { %971 = vmatprep.subr.bf16.mxu0 %v1085_v27 }
  0xbc   : > { %972 = vmatpush3.bf16.msra.mxu0 %v1085_v27 }
  0xbd   : > { %973 = vmatprep.subr.bf16.mxu0 %v1086_v43 }
  0xc0   : > { %974 = vmatpush3.bf16.msra.mxu0 %v1086_v43 }
  0xc1   : > { %975 = vmatprep.subr.bf16.mxu0 %v1087_v44 }
  0xc4   : > { %976 = vmatpush3.bf16.msra.mxu0 %v1087_v44 }
 0x17a   : > { %v939_v29 = vpop.f32.mrb[0].mxu0 }
 0x17b   : > { %v464_v30 = vadd.f32 %v939_v29, %v857_v28  ;;  %v455_v31 = vpop.f32.mrb[1].mxu0 }
 0x17c   : > { %v456_v32 = vadd.f32 %v857_v28, %v455_v31  ;;  %v940_v33 = vpop.f32.mrb[2].mxu0 }
 0x17d   : > { %v467_v34 = vadd.f32 %v940_v33, %v857_v28  ;;  %v458_v35 = vpop.f32.mrb[3].mxu0  ;;  %v472_v37 = vmax.f32 %v464_v30, 0.0 }
 0x17e   : > { %v459_v36 = vadd.f32 %v857_v28, %v458_v35  ;;  %v470_v39 = vmax.f32 %v456_v32, 0.0 }
 0x17f   : > { %v473_v38 = vmax.f32 %v467_v34, 0.0 }
 0x180   : > { %v471_v40 = vmax.f32 %v459_v36, 0.0 }
 0x181   : > { %v475_v41 = vpack.c.bf16 %v473_v38, %v472_v37 }
 0x182   : > { %v474_v42 = vpack.c.bf16 %v471_v40, %v470_v39 }
 0x184   : > { %957 = vmatprep.mubr.bf16.mxu1 %v474_v42 }
 0x185   : > { %958 = vmatmul.mubr.bf16.vlgmr.msra.gmra.mrb[0].mxu1 %v475_v41 }
 0x258   : > { %v959_v46 = vpop.f32.mrb[0].mxu1 }
 0x259   : > { %v590_v47 = vadd.f32 %v959_v46, %v866_v45  ;;  %v581_v48 = vpop.f32.mrb[1].mxu1 }
 0x25a   : > { %v582_v49 = vadd.f32 %v866_v45, %v581_v48  ;;  %v960_v50 = vpop.f32.mrb[2].mxu1 }
 0x25b   : > { %v593_v51 = vadd.f32 %v960_v50, %v866_v45  ;;  %v584_v52 = vpop.f32.mrb[3].mxu1  ;;  %v598_v54 = vmax.f32 %v590_v47, 0.0 }
 0x25c   : > { %v585_v53 = vadd.f32 %v866_v45, %v584_v52  ;;  %v596_v56 = vmax.f32 %v582_v49, 0.0 }
 0x25d   : > { %v599_v55 = vmax.f32 %v593_v51, 0.0 }
 0x25e   : > { %v597_v57 = vmax.f32 %v585_v53, 0.0 }
 0x25f   : > { %v601_v58 = vpack.c.bf16 %v599_v55, %v598_v54 }
 0x260   : > { %v600_v59 = vpack.c.bf16 %v597_v57, %v596_v56 }
 0x262   : > { %977 = vmatprep.mubr.bf16.mxu0 %v600_v59 }
 0x263   : > { %978 = vmatmul.mubr.bf16.vlgmr.msra.gmra.mrb[4].mxu0 %v601_v58 }
 0x336   : > { %v979_v61 = vpop.f32.mrb[4].mxu0 }
 0x337   : > { %v716_v62 = vadd.f32 %v979_v61, %v875_v60  ;;  %v707_v63 = vpop.f32.mrb[5].mxu0 }
 0x338   : > { %v708_v0 = vadd.f32 %v875_v60, %v707_v63  ;;  %v980_v1 = vpop.f32.mrb[6].mxu0 }
 0x339   : > { %724 = vst [vmem:[%s340_s15 + $0x10] sm:$0xff] %v716_v62  ;;  %v719_v2 = vadd.f32 %v980_v1, %v875_v60  ;;  %v710_v3 = vpop.f32.mrb[7].mxu0 }
 0x33a   : > { %722 = vst [vmem:[%s340_s15] sm:$0xff] %v708_v0  ;;  %v711_v4 = vadd.f32 %v875_v60, %v710_v3 }
 0x33b   : > { %725 = vst [vmem:[%s340_s15 + $0x18] sm:$0xff] %v719_v2 }
 0x33c   : > { %723 = vst [vmem:[%s340_s15 + $0x8] sm:$0xff] %v711_v4 }
 0x33d   : > { %1215 = shalt.err (!%p1212_p4)
}
 0x33e   : > { %s1216_s23 = scalar_lea.hbm %s1572_s16, 512  ;;  %s1220_s14 = scalar_lea.hbm %s1623_s7, 1024 }
 0x33f   : > { %p1217_p9 = scmp.ne.s32.totalorder %s1572_s16, %s1216_s23  ;;  %p1221_p8 = scmp.lt.u32.totalorder %s1572_s16, %s1623_s7 }
 0x340   : > { %p1222_p13 = scmp.lt.u32.totalorder %s1220_s14, %s1216_s23  ;;  %p1224_p10 = scmp.lt.u32.totalorder %s1216_s23, %s1572_s16 }
 0x341   : > { %p1218_p0 = pnand %p1217_p9, %p1483_p5 }
 0x342   : > { %p1223_p6 = por %p1222_p13, %p1221_p8 }
 0x343   : > { %p1219_p11 = pneg %p1218_p0 }
 0x344   : > { %p1225_p3 = por %p1224_p10, %p1223_p6 }
 0x346   : > { %p1226_p7 = pnand %p1225_p3, %p1219_p11 }
 0x348   : > { %1229 = shalt.err (!%p1226_p7)
}
 0x349   : > { %s1287_s8 = smov 128   ;;  %s1288_s17 = smov 8  }
 0x34a   : > { %995 = dma.vmem_to_hbm [thread:$0]  (%p1483_p5), %s1567_s29, 512, %s1572_s16, %s727_s28, %s1287_s8, %s1287_s8, %s1288_s17  }
 0x34b PF: > { %s1643_s13 = sld [smem:[#allocation15_spill]]  ;;  %s755_s20 = sand.u32 1, %s1264_s24  }
 0x34c   : > { %p1645_p1 = scmp.ge.s32.totalorder %s1276_s27, 2  ;;  %s756_s30 = scalar_lea.sflag [#allocation4], %s755_s20 }
 0x351   : > { %p1644_p12 = scmp.ne.s32.totalorder %s1643_s13, 0 }
 0x353   : > { %p1012_p2 = pnand %p1645_p1, %p1644_p12 }
 0x355   : > { %1259 = dma.done.wait (!%p1012_p2), %s756_s30, 512  }
 0x356   : > { %1261 = vsyncadd (!%p1012_p2), %s756_s30, 4294966784  ;;  %p22_p4 = scmp.ge.s32.totalorder %s1469_s22, 4   ;;  %s1646_s24 = smov %s1268_s25 }
 0x357   : > { %s1647_s25 = smov %s1272_s26  ;;  %s1648_s26 = smov %s1479_s18 }
 0x358   : > { %s1649_s27 = smov %s1469_s22  ;;  %24 = sbr.rel (!%p22_p4) target bundleno = 7 (0x7), region = 105 }
 0x35f   :  { %761 = vsyncpa [#allocation3], 1 }
 0x360   :  { %763 = vsyncpa [#allocation3 + $0x1], 1 }
 0x361   :  { %764 = vsyncpa [#allocation6], 1 }
 0x362   :  { %765 = vsyncpa [#allocation9], 1 }
 0x363   :  { %766 = vsyncpa [#allocation4], 1 }
 0x364   :  { %768 = vsyncpa [#allocation4 + $0x1], 1 }

// kernel: tpu_custom_call.1
= control target key start
LH: loop header
LB: loop body
LE: loop exit
PB: predicated region body
PF: predicated region fallthrough
CT: control target
= control target key end

     0   :  { %12 = vsyncpa [#allocation3], 0  ;;  %s1616_s0 = inlined_call_operand.hbm [shape: f32[64,128], index: 0, kind: input, shape index: {}]   ;;  %s1617_s1 = inlined_call_operand.hbm [shape: bf16[128,128], index: 1, kind: input, shape index: {}]   ;;  %s1618_s2 = inlined_call_operand.vmem [shape: f32[1,128], index: 2, kind: input, shape index: {}]   ;;  %s1619_s3 = inlined_call_operand.hbm [shape: bf16[128,128], index: 3, kind: input, shape index: {}]   ;;  %s1620_s4 = inlined_call_operand.vmem [shape: f32[1,128], index: 4, kind: input, shape index: {}]   ;;  %s1621_s5 = inlined_call_operand.hbm [shape: bf16[128,128], index: 5, kind: input, shape index: {}]   ;;  %s1622_s6 = inlined_call_operand.vmem [shape: f32[1,128], index: 6, kind: input, shape index: {}]   ;;  %s1623_s7 = inlined_call_operand.hbm [shape: f32[64,128], index: 7, kind: output, shape index: {}]  }
   0x1   :  { %14 = vsyncpa [#allocation3 + $0x1], 0 }
   0x2   :  { %15 = vsyncpa [#allocation6], 0 }
   0x3   :  { %16 = vsyncpa [#allocation9], 0 }
   0x4   :  { %17 = vsyncpa [#allocation4], 0 }
   0x5   :  { %19 = vsyncpa [#allocation4 + $0x1], 0  ;;  %s1329_s24 = smov 0   ;;  %s1331_s25 = smov 0  }
   0x6   :  { %s1333_s26 = smov 0   ;;  %s1335_s27 = smov 0  }
   0x7 LB: > { %s1350_s28 = sadd.s32 4294967295, %s1276_s27   ;;  %s842_s29 = sadd.s32 4294967294, %s1276_s27   ;;  %s1276_s27 = sphi %s1335_s27, %s1649_s27   ;;  %s1272_s26 = sphi %s1333_s26, %s1648_s26   ;;  %s1268_s25 = sphi %s1331_s25, %s1647_s25   ;;  %s1264_s24 = sphi %s1329_s24, %s1646_s24  }
   0x8   : > { %p45_p0 = scmp.ne.s32.totalorder %s1268_s25, %s1264_s24  ;;  %p1624_p1 = scmp.eq.s32.totalorder %s1350_s28, 0 }
   0x9   : > { %p201_p3 = scmp.eq.s32.totalorder %s842_s29, 1  ;;  %p843_p5 = scmp.ge.s32.totalorder %s1276_s27, 1 }
   0xa   : > { %p1359_p4 = por %p1624_p1, %p45_p0  ;;  %p208_p7 = scmp.lt.s32.totalorder %s1276_s27, 3 }
   0xb   : > { %p1364_p6 = por %p201_p3, %p45_p0  ;;  %s1278_s10 = smov [#allocation5]  }
   0xc   : > { %s1628_s30 = scalar_select %p1359_p4, 1, 0 }
   0xd   : > { %s1629_s8 = scalar_select %p1364_p6, 1, 0 }
   0xe   : > { %p1369_p8 = pnand %p843_p5, %p208_p7  ;;  %s220_s11 = sshll.u32 %s1278_s10, 4  ;;  %s1373_s11 = int_to_ptr.vmem [resolvable:$true] %s220_s11 }
   0xf   : > { %1630 = sst [smem:[#allocation15_spill]] %s1629_s8  ;;  %s1279_s13 = smov [#allocation7]  }
  0x10   : > { %s1631_s9 = scalar_select %p1369_p8, 1, 0 }
  0x11   : > { %p997_p9 = pneg %p1369_p8  ;;  %s236_s14 = sshll.u32 %s1279_s13, 4  ;;  %s1384_s14 = int_to_ptr.vmem [resolvable:$true] %s236_s14 }
  0x12   : > { %s1280_s15 = smov [#allocation8]   ;;  %s1088_s19 = scalar_lea.hbm %s1617_s1, 1024 }
  0x13   : > { %p1380_p11 = pnand %p997_p9, %p1624_p1  ;;  %s1386_s16 = sshll.u32 %s1280_s15, 4  ;;  %s253_s16 = int_to_ptr.vmem [resolvable:$true] %s1386_s16 }
  0x14   : > { %p1089_p12 = scmp.ne.s32.totalorder %s1617_s1, %s1088_s19  ;;  %p1095_p5 = scmp.lt.u32.totalorder %s1088_s19, %s1617_s1 }
  0x15   : > { %p1396_p13 = pneg %p1380_p11 }
  0x17   : > { %p1091_p0 = pnand %p1396_p13, %p1089_p12 }
  0x19   : > { %p1092_p3 = pneg %p1091_p0 }
  0x1b   : > { %p1097_p7 = pnand %p1095_p5, %p1092_p3 }
  0x1d   : > { %1100 = shalt.err (!%p1097_p7)
}
  0x1e   : > { %s1101_s10 = scalar_lea.vmem %s1373_s11, 1024  ;;  %p1109_p2 = scmp.lt.s32.totalorder %s1373_s11, %s1373_s11 }
  0x1f   : > { %p1102_p9 = scmp.ne.s32.totalorder %s1373_s11, %s1101_s10  ;;  %p1110_p6 = scmp.lt.s32.totalorder %s1101_s10, %s1101_s10 }
  0x21   : > { %p1104_p10 = pnand %p1102_p9, %p1396_p13  ;;  %p1111_p12 = por %p1110_p6, %p1109_p2 }
  0x23   : > { %p1105_p1 = pneg %p1104_p10 }
  0x25   : > { %p1112_p0 = pnand %p1111_p12, %p1105_p1 }
  0x27   : > { %1115 = shalt.err (!%p1112_p0)
}
  0x28   : > { %s1281_s13 = smov 64   ;;  %s1282_s15 = smov 4  }
  0x29   : > { %1000 = dma.hbm_to_vmem [thread:$0]  (!%p1380_p11), %s1617_s1, 1024, %s1373_s11, [#allocation6], %s1281_s13, %s1281_s13, %s1282_s15  }
  0x2a   : > { %s1116_s21 = scalar_lea.hbm %s1619_s3, 1024 }
  0x2b   : > { %p1117_p1 = scmp.ne.s32.totalorder %s1619_s3, %s1116_s21  ;;  %p1123_p10 = scmp.lt.u32.totalorder %s1116_s21, %s1619_s3 }
  0x2d   : > { %p1119_p2 = pnand %p1117_p1, %p1396_p13 }
  0x2f   : > { %p1120_p6 = pneg %p1119_p2 }
  0x31   : > { %p1125_p3 = pnand %p1123_p10, %p1120_p6 }
  0x33   : > { %1128 = shalt.err (!%p1125_p3)
}
  0x34   : > { %s1129_s11 = scalar_lea.vmem %s1384_s14, 1024  ;;  %p1137_p12 = scmp.lt.s32.totalorder %s1384_s14, %s1384_s14 }
  0x35   : > { %p1130_p5 = scmp.ne.s32.totalorder %s1384_s14, %s1129_s11  ;;  %p1138_p0 = scmp.lt.s32.totalorder %s1129_s11, %s1129_s11 }
  0x37   : > { %p1132_p7 = pnand %p1130_p5, %p1396_p13  ;;  %p1139_p1 = por %p1138_p0, %p1137_p12 }
  0x39   : > { %p1133_p9 = pneg %p1132_p7 }
  0x3b   : > { %p1140_p2 = pnand %p1139_p1, %p1133_p9 }
  0x3d   : > { %1143 = shalt.err (!%p1140_p2)
}
  0x3e   : > { %1003 = dma.hbm_to_vmem [thread:$0]  (!%p1380_p11), %s1619_s3, 1024, %s1384_s14, [#allocation6], %s1281_s13, %s1281_s13, %s1282_s15  }
  0x3f   : > { %s1144_s20 = scalar_lea.hbm %s1621_s5, 1024 }
  0x40   : > { %p1145_p6 = scmp.ne.s32.totalorder %s1621_s5, %s1144_s20  ;;  %p1151_p5 = scmp.lt.u32.totalorder %s1144_s20, %s1621_s5 }
  0x42   : > { %p1147_p10 = pnand %p1145_p6, %p1396_p13 }
  0x44   : > { %p1148_p3 = pneg %p1147_p10 }
  0x46   : > { %p1153_p7 = pnand %p1151_p5, %p1148_p3 }
  0x48   : > { %1156 = shalt.err (!%p1153_p7)
}
  0x49   : > { %s1157_s11 = scalar_lea.vmem %s253_s16, 1024  ;;  %p1165_p1 = scmp.lt.s32.totalorder %s253_s16, %s253_s16 }
  0x4a   : > { %p1158_p9 = scmp.ne.s32.totalorder %s253_s16, %s1157_s11  ;;  %p1166_p2 = scmp.lt.s32.totalorder %s1157_s11, %s1157_s11 }
  0x4c   : > { %p1160_p12 = pnand %p1158_p9, %p1396_p13  ;;  %p1167_p4 = por %p1166_p2, %p1165_p1 }
  0x4e   : > { %p1161_p0 = pneg %p1160_p12 }
  0x50   : > { %p1168_p8 = pnand %p1167_p4, %p1161_p0 }
  0x52   : > { %1171 = shalt.err (!%p1168_p8)
}
  0x53   : > { %1006 = dma.hbm_to_vmem [thread:$0]  (!%p1380_p11), %s1621_s5, 1024, %s253_s16, [#allocation9], %s1281_s13, %s1281_s13, %s1282_s15  }
  0x54   : > { %s1469_s22 = sadd.s32 1, %s1276_s27   ;;  %s32_s17 = sadd.s32 1, %s1272_s26 }
  0x55   : > { %s29_s12 = ssub.s32 %s1276_s27, %s1469_s22  ;;  %p39_p8 = scmp.ne.s32.totalorder %s1272_s26, %s1268_s25 }
  0x56   : > { %p30_p4 = scmp.eq.s32.totalorder %s29_s12, 0  ;;  %p40_p13 = scmp.eq.s32.totalorder %s1276_s27, 0 }
  0x57   : > { %p1018_p6 = scmp.lt.s32.totalorder %s1276_s27, 2  ;;  %p1634_p3 = scmp.eq.s32.totalorder %s1350_s28, 1 }
  0x58   : > { %s1479_s18 = scalar_select %p30_p4, %s1272_s26, %s32_s17  }
  0x59   : > { %p41_p10 = por %p40_p13, %p39_p8  ;;  %p1483_p5 = por %p1634_p3, %p39_p8 }
  0x5a   : > { %s269_s20 = sand.u32 1, %s1272_s26   ;;  %s889_s21 = sshll.u32 %s1276_s27, 9 }
  0x5b   : > { %s848_s16 = sshll.u32 %s269_s20, 5  ;;  %s1492_s23 = scalar_lea.hbm %s1616_s0, %s889_s21 }
  0x5c   : > { %s273_s29 = scalar_lea.vmem [#allocation2], %s848_s16  ;;  %p1494_p11 = pnand %p1018_p6, %p41_p10 }
  0x5d   : > { %s280_s10 = sshll.u32 %s273_s29, 4  ;;  %s1500_s14 = scalar_lea.sflag [#allocation3], %s269_s20  ;;  %s1498_s10 = int_to_ptr.vmem [resolvable:$true] %s280_s10 }
  0x5e   : > { %s1172_s8 = scalar_lea.hbm %s1492_s23, 512  ;;  %p1174_p9 = pneg %p1494_p11 }
  0x5f   : > { %p1173_p7 = scmp.ne.s32.totalorder %s1492_s23, %s1172_s8  ;;  %s1177_s21 = scalar_lea.hbm %s1616_s0, 1024 }
  0x60   : > { %p1178_p1 = scmp.lt.u32.totalorder %s1492_s23, %s1616_s0  ;;  %p1179_p2 = scmp.lt.u32.totalorder %s1177_s21, %s1172_s8 }
  0x61   : > { %p1175_p12 = pnand %p1174_p9, %p1173_p7  ;;  %p1181_p8 = scmp.lt.u32.totalorder %s1172_s8, %s1492_s23 }
  0x62   : > { %p1180_p4 = por %p1179_p2, %p1178_p1 }
  0x63   : > { %p1176_p0 = pneg %p1175_p12 }
  0x64   : > { %p1182_p13 = por %p1181_p8, %p1180_p4 }
  0x66   : > { %p1183_p6 = pnand %p1182_p13, %p1176_p0 }
  0x68   : > { %1186 = shalt.err (!%p1183_p6)
}
  0x69   : > { %s1187_s20 = scalar_lea.vmem %s1498_s10, 512  ;;  %s1283_s15 = smov [#allocation2]  }
  0x6a   : > { %p1188_p10 = scmp.ne.s32.totalorder %s1498_s10, %s1187_s20  ;;  %s1192_s29 = sshll.u32 %s1283_s15, 4  ;;  %s1193_s29 = int_to_ptr.vmem [resolvable:$false] %s1192_s29 }
  0x6b   : > { %s1194_s12 = scalar_lea.vmem %s1193_s29, 1024  ;;  %p1195_p12 = scmp.lt.s32.totalorder %s1498_s10, %s1193_s29 }
  0x6c   : > { %p1190_p3 = pnand %p1188_p10, %p1174_p9  ;;  %p1196_p1 = scmp.lt.s32.totalorder %s1194_s12, %s1187_s20 }
  0x6e   : > { %p1191_p7 = pneg %p1190_p3  ;;  %p1197_p2 = por %p1196_p1, %p1195_p12 }
  0x70   : > { %p1198_p4 = pnand %p1197_p2, %p1191_p7 }
  0x72   : > { %1201 = shalt.err (!%p1198_p4)
}
  0x73   : > { %s1284_s8 = smov 128   ;;  %s1285_s17 = smov 8  }
  0x74   : > { %1010 = dma.hbm_to_vmem [thread:$0]  (!%p1494_p11), %s1492_s23, 512, %s1498_s10, %s1500_s14, %s1284_s8, %s1284_s8, %s1285_s17  }
  0x75   : > { %p1637_p9 = scmp.ne.s32.totalorder %s1631_s9, 0 }
  0x76   : > { %s1531_s21 = sand.u32 (!%p1637_p9), 1, %s1268_s25   ;;  %p1638_p0 = scmp.ne.s32.totalorder (!%p1637_p9), %s1628_s30, 0 }
  0x77   : > { %292 = sbr.rel (%p1637_p9) target bundleno = 843 (0x34b), region = 48  ;;  %s852_s16 = sshll.u32 (!%p1637_p9), %s1531_s21, 5 }
  0x78   : > { %s295_s13 = scalar_lea.sflag (!%p1637_p9), [#allocation3], %s1531_s21  ;;  %s1537_s20 = scalar_lea.vmem (!%p1637_p9), [#allocation2], %s852_s16 }
  0x7e   : > { %1247 = dma.done.wait (%p1638_p0), %s295_s13, 512  }
  0x7f   : > { %1249 = vsyncadd (%p1638_p0), %s295_s13, 4294966784  ;;  %p1639_p11 = scmp.eq.s32.totalorder %s1350_s28, 0 }
  0x81   : > { %1251 = dma.done.wait (%p1639_p11), [#allocation6], 2048   ;;  %p1640_p8 = pmov %p1639_p11 }
  0x83   : > { %1253 = vsyncadd (%p1640_p8), [#allocation6], 4294965248  ;;  %p1641_p13 = pmov %p1640_p8 }
  0x84   : > { %p1642_p6 = pmov %p1640_p8 }
  0x85   : > { %1255 = dma.done.wait (%p1641_p13), [#allocation9], 1024  }
  0x86   : > { %1257 = vsyncadd (%p1642_p6), [#allocation9], 4294966272  ;;  %v1064_v0 = vld [vmem:[#allocation5] sm:$0xff]   ;;  %v1065_v1 = vld [vmem:[#allocation5 + $0x8] sm:$0xff]   ;;  %s340_s15 = scalar_lea.vmem [#allocation10], %s852_s16  ;;  %s890_s12 = sshll.u32 %s1350_s28, 9 }
  0x87   : > { %921 = vmatprep.subr.bf16.mxu0 %v1064_v0  ;;  %v1066_v2 = vld [vmem:[#allocation5 + $0x10] sm:$0xff]   ;;  %v1067_v3 = vld [vmem:[#allocation5 + $0x18] sm:$0xff]   ;;  %v344_v4 = vld [vmem:[%s1537_s20] sm:$0xff]  ;;  %s740_s29 = sshll.u32 %s340_s15, 4  ;;  %s1572_s16 = scalar_lea.hbm %s1623_s7, %s890_s12  ;;  %s1567_s29 = int_to_ptr.vmem [resolvable:$true] %s740_s29 }
  0x88   : > { %922 = vmatpush3.bf16.msra.mxu0 %v1064_v0  ;;  %v345_v5 = vld [vmem:[%s1537_s20 + $0x8] sm:$0xff]  ;;  %v1072_v7 = vld [vmem:[#allocation7] sm:$0xff]   ;;  %v1074_v10 = vld [vmem:[#allocation7 + $0x10] sm:$0xff]   ;;  %s727_s28 = scalar_lea.sflag [#allocation4], %s1531_s21  ;;  %s1202_s13 = scalar_lea.vmem %s1567_s29, 512 }
  0x89   : > { %923 = vmatprep.subr.bf16.mxu0 %v1065_v1  ;;  %v348_v6 = vpack.c.bf16 %v345_v5, %v344_v4  ;;  %v1073_v8 = vld [vmem:[#allocation7 + $0x8] sm:$0xff]   ;;  %v1068_v9 = vld [vmem:[#allocation5 + $0x20] sm:$0xff]   ;;  %941 = vmatprep.subr.bf16.mxu1 %v1072_v7  ;;  %v1075_v12 = vld [vmem:[#allocation7 + $0x18] sm:$0xff]   ;;  %p1203_p10 = scmp.ne.s32.totalorder %s1567_s29, %s1202_s13 }
  0x8a   : > { %942 = vmatpush3.bf16.msra.mxu1 %v1072_v7  ;;  %v1069_v11 = vld [vmem:[#allocation5 + $0x28] sm:$0xff]   ;;  %v1070_v13 = vld [vmem:[#allocation5 + $0x30] sm:$0xff]   ;;  %v1076_v14 = vld [vmem:[#allocation7 + $0x20] sm:$0xff]  }
  0x8b   : > { %937 = vmatprep.mubr.bf16.mxu0 %v348_v6  ;;  %943 = vmatprep.subr.bf16.mxu1 %v1073_v8  ;;  %v1071_v15 = vld [vmem:[#allocation5 + $0x38] sm:$0xff]   ;;  %v1077_v16 = vld [vmem:[#allocation7 + $0x28] sm:$0xff]   ;;  %v346_v17 = vld [vmem:[%s1537_s20 + $0x10] sm:$0xff]  ;;  %p1204_p3 = pnand %p1203_p10, %p1483_p5 }
  0x8c   : > { %924 = vmatpush3.bf16.msra.mxu0 %v1065_v1  ;;  %v347_v18 = vld [vmem:[%s1537_s20 + $0x18] sm:$0xff]  ;;  %v1078_v20 = vld [vmem:[#allocation7 + $0x30] sm:$0xff]   ;;  %v1080_v22 = vld [vmem:[#allocation8] sm:$0xff]   ;;  %s1286_s20 = smov [#allocation10]  }
  0x8d   : > { %925 = vmatprep.subr.bf16.mxu0 %v1066_v2  ;;  %v349_v19 = vpack.c.bf16 %v347_v18, %v346_v17  ;;  %v1079_v21 = vld [vmem:[#allocation7 + $0x38] sm:$0xff]   ;;  %v1081_v23 = vld [vmem:[#allocation8 + $0x8] sm:$0xff]   ;;  %v1082_v24 = vld [vmem:[#allocation8 + $0x10] sm:$0xff]   ;;  %p1205_p7 = pneg %p1204_p3  ;;  %s1206_s30 = sshll.u32 %s1286_s20, 4  ;;  %s1207_s30 = int_to_ptr.vmem [resolvable:$false] %s1206_s30 }
  0x8e   : > { %944 = vmatpush3.bf16.msra.mxu1 %v1073_v8  ;;  %v1083_v25 = vld [vmem:[#allocation8 + $0x18] sm:$0xff]   ;;  %v1084_v26 = vld [vmem:[#allocation8 + $0x20] sm:$0xff]   ;;  %v1085_v27 = vld [vmem:[#allocation8 + $0x28] sm:$0xff]   ;;  %s1208_s9 = scalar_lea.vmem %s1207_s30, 1024  ;;  %p1209_p12 = scmp.lt.s32.totalorder %s1567_s29, %s1207_s30 }
  0x8f   : > { %945 = vmatprep.subr.bf16.mxu1 %v1074_v10  ;;  %v857_v28 = vld [vmem:[%s1618_s2] ss:$0 sm:$0xff]  ;;  %v1086_v43 = vld [vmem:[#allocation8 + $0x30] sm:$0xff]   ;;  %v1087_v44 = vld [vmem:[#allocation8 + $0x38] sm:$0xff]   ;;  %p1210_p1 = scmp.lt.s32.totalorder %s1208_s9, %s1202_s13 }
  0x90   : > { %926 = vmatpush3.bf16.msra.mxu0 %v1066_v2  ;;  %v866_v45 = vld [vmem:[%s1620_s4] ss:$0 sm:$0xff] }
  0x91   : > { %927 = vmatprep.subr.bf16.mxu0 %v1067_v3  ;;  %v875_v60 = vld [vmem:[%s1622_s6] ss:$0 sm:$0xff]  ;;  %p1211_p2 = por %p1210_p1, %p1209_p12 }
  0x92   : > { %946 = vmatpush3.bf16.msra.mxu1 %v1074_v10 }
  0x93   : > { %947 = vmatprep.subr.bf16.mxu1 %v1075_v12  ;;  %p1212_p4 = pnand %p1211_p2, %p1205_p7 }
  0x94   : > { %928 = vmatpush3.bf16.msra.mxu0 %v1067_v3 }
  0x95   : > { %929 = vmatprep.subr.bf16.mxu0 %v1068_v9 }
  0x96   : > { %948 = vmatpush3.bf16.msra.mxu1 %v1075_v12 }
  0x97   : > { %949 = vmatprep.subr.bf16.mxu1 %v1076_v14 }
  0x98   : > { %930 = vmatpush3.bf16.msra.mxu0 %v1068_v9 }
  0x99   : > { %931 = vmatprep.subr.bf16.mxu0 %v1069_v11 }
  0x9a   : > { %950 = vmatpush3.bf16.msra.mxu1 %v1076_v14 }
  0x9b   : > { %951 = vmatprep.subr.bf16.mxu1 %v1077_v16 }
  0x9c   : > { %932 = vmatpush3.bf16.msra.mxu0 %v1069_v11 }
  0x9d   : > { %933 = vmatprep.subr.bf16.mxu0 %v1070_v13 }
  0x9e   : > { %952 = vmatpush3.bf16.msra.mxu1 %v1077_v16 }
  0x9f   : > { %953 = vmatprep.subr.bf16.mxu1 %v1078_v20 }
  0xa0   : > { %934 = vmatpush3.bf16.msra.mxu0 %v1070_v13 }
  0xa1   : > { %935 = vmatprep.subr.bf16.mxu0 %v1071_v15 }
  0xa2   : > { %954 = vmatpush3.bf16.msra.mxu1 %v1078_v20 }
  0xa3   : > { %955 = vmatprep.subr.bf16.mxu1 %v1079_v21 }
  0xa4   : > { %936 = vmatpush3.bf16.msra.mxu0 %v1071_v15 }
  0xa5   : > { %961 = vmatprep.subr.bf16.mxu0 %v1080_v22 }
  0xa6   : > { %956 = vmatpush3.bf16.msra.mxu1 %v1079_v21 }
  0xa7   : > { %938 = vmatmul.mubr.bf16.vlgmr.msra.gmra.mrb[0].mxu0 %v349_v19 }
  0xa8   : > { %962 = vmatpush3.bf16.msra.mxu0 %v1080_v22 }
  0xa9   : > { %963 = vmatprep.subr.bf16.mxu0 %v1081_v23 }
  0xac   : > { %964 = vmatpush3.bf16.msra.mxu0 %v1081_v23 }
  0xad   : > { %965 = vmatprep.subr.bf16.mxu0 %v1082_v24 }
  0xb0   : > { %966 = vmatpush3.bf16.msra.mxu0 %v1082_v24 }
  0xb1   : > { %967 = vmatprep.subr.bf16.mxu0 %v1083_v25 }
  0xb4   : > { %968 = vmatpush3.bf16.msra.mxu0 %v1083_v25 }
  0xb5   : > { %969 = vmatprep.subr.bf16.mxu0 %v1084_v26 }
  0xb8   : > { %970 = vmatpush3.bf16.msra.mxu0 %v1084_v26 }
  0xb9   : > { %971 = vmatprep.subr.bf16.mxu0 %v1085_v27 }
  0xbc   : > { %972 = vmatpush3.bf16.msra.mxu0 %v1085_v27 }
  0xbd   : > { %973 = vmatprep.subr.bf16.mxu0 %v1086_v43 }
  0xc0   : > { %974 = vmatpush3.bf16.msra.mxu0 %v1086_v43 }
  0xc1   : > { %975 = vmatprep.subr.bf16.mxu0 %v1087_v44 }
  0xc4   : > { %976 = vmatpush3.bf16.msra.mxu0 %v1087_v44 }
 0x17a   : > { %v939_v29 = vpop.f32.mrb[0].mxu0 }
 0x17b   : > { %v464_v30 = vadd.f32 %v939_v29, %v857_v28  ;;  %v455_v31 = vpop.f32.mrb[1].mxu0 }
 0x17c   : > { %v456_v32 = vadd.f32 %v857_v28, %v455_v31  ;;  %v940_v33 = vpop.f32.mrb[2].mxu0 }
 0x17d   : > { %v467_v34 = vadd.f32 %v940_v33, %v857_v28  ;;  %v458_v35 = vpop.f32.mrb[3].mxu0  ;;  %v472_v37 = vmax.f32 %v464_v30, 0.0 }
 0x17e   : > { %v459_v36 = vadd.f32 %v857_v28, %v458_v35  ;;  %v470_v39 = vmax.f32 %v456_v32, 0.0 }
 0x17f   : > { %v473_v38 = vmax.f32 %v467_v34, 0.0 }
 0x180   : > { %v471_v40 = vmax.f32 %v459_v36, 0.0 }
 0x181   : > { %v475_v41 = vpack.c.bf16 %v473_v38, %v472_v37 }
 0x182   : > { %v474_v42 = vpack.c.bf16 %v471_v40, %v470_v39 }
 0x184   : > { %957 = vmatprep.mubr.bf16.mxu1 %v474_v42 }
 0x185   : > { %958 = vmatmul.mubr.bf16.vlgmr.msra.gmra.mrb[0].mxu1 %v475_v41 }
 0x258   : > { %v959_v46 = vpop.f32.mrb[0].mxu1 }
 0x259   : > { %v590_v47 = vadd.f32 %v959_v46, %v866_v45  ;;  %v581_v48 = vpop.f32.mrb[1].mxu1 }
 0x25a   : > { %v582_v49 = vadd.f32 %v866_v45, %v581_v48  ;;  %v960_v50 = vpop.f32.mrb[2].mxu1 }
 0x25b   : > { %v593_v51 = vadd.f32 %v960_v50, %v866_v45  ;;  %v584_v52 = vpop.f32.mrb[3].mxu1  ;;  %v598_v54 = vmax.f32 %v590_v47, 0.0 }
 0x25c   : > { %v585_v53 = vadd.f32 %v866_v45, %v584_v52  ;;  %v596_v56 = vmax.f32 %v582_v49, 0.0 }
 0x25d   : > { %v599_v55 = vmax.f32 %v593_v51, 0.0 }
 0x25e   : > { %v597_v57 = vmax.f32 %v585_v53, 0.0 }
 0x25f   : > { %v601_v58 = vpack.c.bf16 %v599_v55, %v598_v54 }
 0x260   : > { %v600_v59 = vpack.c.bf16 %v597_v57, %v596_v56 }
 0x262   : > { %977 = vmatprep.mubr.bf16.mxu0 %v600_v59 }
 0x263   : > { %978 = vmatmul.mubr.bf16.vlgmr.msra.gmra.mrb[4].mxu0 %v601_v58 }
 0x336   : > { %v979_v61 = vpop.f32.mrb[4].mxu0 }
 0x337   : > { %v716_v62 = vadd.f32 %v979_v61, %v875_v60  ;;  %v707_v63 = vpop.f32.mrb[5].mxu0 }
 0x338   : > { %v708_v0 = vadd.f32 %v875_v60, %v707_v63  ;;  %v980_v1 = vpop.f32.mrb[6].mxu0 }
 0x339   : > { %724 = vst [vmem:[%s340_s15 + $0x10] sm:$0xff] %v716_v62  ;;  %v719_v2 = vadd.f32 %v980_v1, %v875_v60  ;;  %v710_v3 = vpop.f32.mrb[7].mxu0 }
 0x33a   : > { %722 = vst [vmem:[%s340_s15] sm:$0xff] %v708_v0  ;;  %v711_v4 = vadd.f32 %v875_v60, %v710_v3 }
 0x33b   : > { %725 = vst [vmem:[%s340_s15 + $0x18] sm:$0xff] %v719_v2 }
 0x33c   : > { %723 = vst [vmem:[%s340_s15 + $0x8] sm:$0xff] %v711_v4 }
 0x33d   : > { %1215 = shalt.err (!%p1212_p4)
}
 0x33e   : > { %s1216_s23 = scalar_lea.hbm %s1572_s16, 512  ;;  %s1220_s14 = scalar_lea.hbm %s1623_s7, 1024 }
 0x33f   : > { %p1217_p9 = scmp.ne.s32.totalorder %s1572_s16, %s1216_s23  ;;  %p1221_p8 = scmp.lt.u32.totalorder %s1572_s16, %s1623_s7 }
 0x340   : > { %p1222_p13 = scmp.lt.u32.totalorder %s1220_s14, %s1216_s23  ;;  %p1224_p10 = scmp.lt.u32.totalorder %s1216_s23, %s1572_s16 }
 0x341   : > { %p1218_p0 = pnand %p1217_p9, %p1483_p5 }
 0x342   : > { %p1223_p6 = por %p1222_p13, %p1221_p8 }
 0x343   : > { %p1219_p11 = pneg %p1218_p0 }
 0x344   : > { %p1225_p3 = por %p1224_p10, %p1223_p6 }
 0x346   : > { %p1226_p7 = pnand %p1225_p3, %p1219_p11 }
 0x348   : > { %1229 = shalt.err (!%p1226_p7)
}
 0x349   : > { %s1287_s8 = smov 128   ;;  %s1288_s17 = smov 8  }
 0x34a   : > { %995 = dma.vmem_to_hbm [thread:$0]  (%p1483_p5), %s1567_s29, 512, %s1572_s16, %s727_s28, %s1287_s8, %s1287_s8, %s1288_s17  }
 0x34b PF: > { %s1643_s13 = sld [smem:[#allocation15_spill]]  ;;  %s755_s20 = sand.u32 1, %s1264_s24  }
 0x34c   : > { %p1645_p1 = scmp.ge.s32.totalorder %s1276_s27, 2  ;;  %s756_s30 = scalar_lea.sflag [#allocation4], %s755_s20 }
 0x351   : > { %p1644_p12 = scmp.ne.s32.totalorder %s1643_s13, 0 }
 0x353   : > { %p1012_p2 = pnand %p1645_p1, %p1644_p12 }
 0x355   : > { %1259 = dma.done.wait (!%p1012_p2), %s756_s30, 512  }
 0x356   : > { %1261 = vsyncadd (!%p1012_p2), %s756_s30, 4294966784  ;;  %p22_p4 = scmp.ge.s32.totalorder %s1469_s22, 4   ;;  %s1646_s24 = smov %s1268_s25 }
 0x357   : > { %s1647_s25 = smov %s1272_s26  ;;  %s1648_s26 = smov %s1479_s18 }
 0x358   : > { %s1649_s27 = smov %s1469_s22  ;;  %24 = sbr.rel (!%p22_p4) target bundleno = 7 (0x7), region = 105 }
 0x35f   :  { %761 = vsyncpa [#allocation3], 1 }
 0x360   :  { %763 = vsyncpa [#allocation3 + $0x1], 1 }
 0x361   :  { %764 = vsyncpa [#allocation6], 1 }
 0x362   :  { %765 = vsyncpa [#allocation9], 1 }
 0x363   :  { %766 = vsyncpa [#allocation4], 1 }
 0x364   :  { %768 = vsyncpa [#allocation4 + $0x1], 1 }

</bundles_post_ra>
